<compile_context>
chip_gen: v5e
topology: v5e:2x2
jax: 0.10.0
libtpu: 0.0.40
codegen_flags: <defaults>
</compile_context>

<pallas_src>
import numpy as np
import jax
import jax.numpy as jnp
from jax.experimental import pallas as pl
from jax.experimental.pallas import tpu as pltpu

_MiB = 1024 * 1024


def gated_residual_kernel(x_ref, wt_ref, b_ref, p1_ref, p2_ref, gw_ref, o_ref):
    mm_dtype = wt_ref.dtype                        # MXU operand dtype (f32 or bf16)
    xf = x_ref[...].astype(jnp.float32)            # (TILE_M, H)

    # Inner module: Linear -> out = x @ W.T + b  (wt_ref already holds W.T).
    out = jnp.dot(xf.astype(mm_dtype), wt_ref[...],
                  preferred_element_type=jnp.float32) + b_ref[...]

    # Gating: elementwise / transcendental math in f32 (VPU + EUP path).
    # Casts are folded into the producing ops so f32 temporaries die early.
    gate = jax.nn.sigmoid(out * gw_ref[0])
    left = (xf - xf * gate).astype(mm_dtype)       # x * (1 - gate)
    right = (out * gate).astype(mm_dtype)          # out * gate

    # AdaptiveAvgPool1d over the concatenated feature dim, fused as two matmuls:
    #   pooled = concat([left, right], -1) @ P == left @ P[:H] + right @ P[H:]
    # P is pre-split outside the kernel (no in-kernel ref slicing / lane concat).
    pooled = (jnp.dot(left, p1_ref[...], preferred_element_type=jnp.float32)
              + jnp.dot(right, p2_ref[...], preferred_element_type=jnp.float32))
    o_ref[...] = pooled.astype(o_ref.dtype)


def _adaptive_avg_pool_matrix(L_in: int, L_out: int) -> jnp.ndarray:
    """Exact PyTorch AdaptiveAvgPool1d windows as an (L_in, L_out) matrix."""
    P = np.zeros((L_in, L_out), dtype=np.float32)
    for i in range(L_out):
        s = (i * L_in) // L_out
        e = -(-((i + 1) * L_in) // L_out)  # ceil
        P[s:e, i] = 1.0 / (e - s)
    return jnp.asarray(P)


def _round_up(x: int, m: int) -> int:
    return ((x + m - 1) // m) * m


def _vmem_limit_bytes():
    """Scoped-VMEM limit per generation: ~100 MiB on v5e/v6e (128 MiB physical),
    ~48 MiB on v7x (64 MiB per TensorCore).  None -> keep compiler default."""
    try:
        kind = jax.devices()[0].device_kind.lower()
    except Exception:
        return None
    if "v5" in kind or "v6" in kind:
        return 100 * _MiB
    if "v7" in kind:
        return 48 * _MiB
    return None


def _choose_tile_m(M: int, H: int, H_out: int, mm_bytes: int, budget_bytes: int) -> int:
    """Pick a row-tile size whose full working set fits the scoped-VMEM budget."""

    def footprint(t):
        # W.T, P1, P2 single-buffered (pl.Buffered(1)) + f32 bias.
        resident = (H * H + 2 * H * H_out) * mm_bytes + H * 4
        # Double-buffered streamed x input and pooled output tiles (f32).
        pipelined = 2 * t * (H + H_out) * 4
        # Live intermediates: xf/out/gate (f32), left/right (mm dtype), pooled (f32).
        live = t * (3 * H * 4 + 2 * H * mm_bytes + H_out * 4)
        return resident + pipelined + live

    if footprint(8) > budget_bytes:
        raise ValueError(
            "gated_residual_net: resident weights / pooling matrices do not fit "
            f"the scoped-VMEM budget ({budget_bytes} bytes) even at TILE_M=8; "
            "this fused single-pass kernel would need an additional N/K grid "
            "axis for H this large (not implemented).")

    # Start from a tile that keeps the streamed x block around ~4 MiB (amortizes
    # the ~0.35 us per-grid-step overhead even when H is small), but keep at
    # least ~8 grid blocks when M is large so the v7x megacore split and the
    # software pipeline both have work to overlap.
    tile = _round_up(max(1024, (4 * _MiB) // max(4 * H, 1)), 128)
    tile = min(tile, max(128, _round_up(pl.cdiv(M, 8), 128)))
    tile = min(tile, _round_up(M, 8))          # never exceed (sublane-padded) M
    tile = max(tile, 8)
    while tile > 8 and footprint(tile) > budget_bytes:
        tile = max(8, _round_up(tile // 2, 8))
    return tile


def gated_residual_net(x, W, b, gate_w, downsample_size,
                       matmul_dtype=None, tile_m=None):
    """Fused GatedResidualNet forward.

    x: (B, S, H) float32.  W: (H, H) torch-Linear weight (out, in).  b: (H,).
    gate_w: (1,) GatedResidual.weight.  downsample_size: AdaptiveAvgPool1d size.
    matmul_dtype: optional MXU operand dtype (jnp.bfloat16 recommended on
      v6e/v7x for MXU peak + halved weight DMA); None keeps exact f32 numerics.
    """
    B, S, H = x.shape
    M = B * S
    H_out = int(downsample_size)

    if matmul_dtype is None:
        matmul_dtype = jnp.float32
    mm_bytes = jnp.dtype(matmul_dtype).itemsize

    x2 = x.reshape(M, H)
    Wt = W.T.astype(matmul_dtype)                  # (in, out) so kernel does x @ Wt
    b2 = b.reshape(1, H).astype(jnp.float32)
    P = _adaptive_avg_pool_matrix(2 * H, H_out)
    P1 = P[:H].astype(matmul_dtype)                # split outside the kernel
    P2 = P[H:].astype(matmul_dtype)
    gw = gate_w.reshape(1).astype(jnp.float32)

    vmem_limit = _vmem_limit_bytes()
    budget = int(0.8 * vmem_limit) if vmem_limit is not None else 12 * _MiB
    TILE_M = tile_m if tile_m is not None else _choose_tile_m(M, H, H_out, mm_bytes, budget)
    grid = (pl.cdiv(M, TILE_M),)

    resident = pl.Buffered(1)          # constant-index operands: one buffer, DMA'd once
    cost = pl.CostEstimate(
        flops=2 * M * H * H + 2 * M * (2 * H) * H_out + 6 * M * H,
        transcendentals=M * H,                     # sigmoid
        bytes_accessed=4 * (M * H + M * H_out + H)
        + mm_bytes * (H * H + 2 * H * H_out),
    )

    out = pl.pallas_call(
        gated_residual_kernel,
        out_shape=jax.ShapeDtypeStruct((M, H_out), x.dtype),
        grid=grid,
        in_specs=[
            pl.BlockSpec((TILE_M, H), lambda i: (i, 0)),                        # x: streamed rows
            pl.BlockSpec((H, H), lambda i: (0, 0), pipeline_mode=resident),     # W.T: resident
            pl.BlockSpec((1, H), lambda i: (0, 0), pipeline_mode=resident),     # bias: resident
            pl.BlockSpec((H, H_out), lambda i: (0, 0), pipeline_mode=resident),  # P[:H]
            pl.BlockSpec((H, H_out), lambda i: (0, 0), pipeline_mode=resident),  # P[H:]
            pl.BlockSpec(memory_space=pltpu.MemorySpace.SMEM),                  # gate scalar
        ],
        out_specs=pl.BlockSpec((TILE_M, H_out), lambda i: (i, 0)),              # exact width, no pad
        compiler_params=pltpu.CompilerParams(
            dimension_semantics=("parallel",),     # shard M across TCs (v7x); harmless elsewhere
            vmem_limit_bytes=vmem_limit,
        ),
        cost_estimate=cost,
    )(x2, Wt, b2, P1, P2, gw)

    return out.reshape(B, S, H_out)


def reference(x, W, b, gate_w, downsample_size):
    out = jnp.einsum('bsh,oh->bso', x, W) + b
    gate = jax.nn.sigmoid(out * gate_w[0])
    cat = jnp.concatenate([x * (1 - gate), out * gate], axis=-1)
    L = cat.shape[-1]
    cols = []
    for i in range(downsample_size):
        s = (i * L) // downsample_size
        e = -(-((i + 1) * L) // downsample_size)
        cols.append(cat[..., s:e].mean(-1))
    return jnp.stack(cols, axis=-1)


if __name__ == "__main__":
    B, S, H = 2, 8, 32
    downsample_size = H          # pool 2H -> H ('avg' downsample)

    key = jax.random.PRNGKey(0)
    kx, kw, kb, kg = jax.random.split(key, 4)
    x = jax.random.normal(kx, (B, S, H), dtype=jnp.float32)
    W = jax.random.normal(kw, (H, H), dtype=jnp.float32) * 0.1   # Linear weight (out, in)
    b = jax.random.normal(kb, (H,), dtype=jnp.float32) * 0.1     # Linear bias
    gate_w = jax.random.normal(kg, (1,), dtype=jnp.float32)      # GatedResidual.weight

    y_ref = reference(x, W, b, gate_w, downsample_size)

    # 1) default (exact f32) path, auto tile selection.
    y = jax.block_until_ready(gated_residual_net(x, W, b, gate_w, downsample_size))
    assert y.shape == (B, S, downsample_size)
    np.testing.assert_allclose(np.asarray(y), np.asarray(y_ref), rtol=1e-5, atol=1e-5)

    # 2) forced small tile: multi-step pipelined grid + single-buffered resident
    #    weight revisit path.
    y_tiled = jax.block_until_ready(
        gated_residual_net(x, W, b, gate_w, downsample_size, tile_m=8))
    np.testing.assert_allclose(np.asarray(y_tiled), np.asarray(y_ref), rtol=1e-5, atol=1e-5)

    # 3) ragged M (M % TILE_M != 0): last block computes on Pallas-padded rows,
    #    writeback clipped to the real rows.
    x_r = jax.random.normal(kx, (B, 7, H), dtype=jnp.float32)
    y_r_ref = reference(x_r, W, b, gate_w, downsample_size)
    y_r = jax.block_until_ready(
        gated_residual_net(x_r, W, b, gate_w, downsample_size, tile_m=8))
    np.testing.assert_allclose(np.asarray(y_r), np.asarray(y_r_ref), rtol=1e-5, atol=1e-5)

    # 4) opt-in bf16 MXU operands (v6e/v7x throughput path); f32 accumulation,
    #    loosened tolerance because matmul operands are quantized.
    y_bf16 = jax.block_until_ready(
        gated_residual_net(x, W, b, gate_w, downsample_size,
                           matmul_dtype=jnp.bfloat16))
    np.testing.assert_allclose(np.asarray(y_bf16), np.asarray(y_ref), rtol=5e-2, atol=5e-2)

    print("KERNEL_OK")
</pallas_src>

<mosaic_0001>
module attributes {stable_mosaic.version = 11 : i64} {
  func.func @gated_residual_kernel(%arg0: i32, %arg1: memref<16x32xf32, #tpu.memory_space<vmem>>, %arg2: memref<32x32xf32, #tpu.memory_space<vmem>>, %arg3: memref<1x32xf32, #tpu.memory_space<vmem>>, %arg4: memref<32x32xf32, #tpu.memory_space<vmem>>, %arg5: memref<32x32xf32, #tpu.memory_space<vmem>>, %arg6: memref<1xf32, #tpu.memory_space<smem>>, %arg7: memref<16x32xf32, #tpu.memory_space<vmem>>) attributes {dimension_semantics = [#tpu.dimension_semantics<parallel>], iteration_bounds = array<i64: 1>, scalar_prefetch = 0 : i64, scratch_operands = 0 : i64, tpu.core_type = #tpu.core_type<tc>, window_params = [{transform_indices = @transform_0, window_bounds = array<i64: 16, 32>}, {pipeline_mode = #tpu.pipeline_mode<synchronous>, transform_indices = @transform_1, window_bounds = array<i64: 32, 32>}, {pipeline_mode = #tpu.pipeline_mode<synchronous>, transform_indices = @transform_2, window_bounds = array<i64: 1, 32>}, {pipeline_mode = #tpu.pipeline_mode<synchronous>, transform_indices = @transform_3, window_bounds = array<i64: 32, 32>}, {pipeline_mode = #tpu.pipeline_mode<synchronous>, transform_indices = @transform_4, window_bounds = array<i64: 32, 32>}, {transform_indices = @transform_5, window_bounds = array<i64: 1>}, {transform_indices = @transform_6, window_bounds = array<i64: 16, 32>}]} {
    %c0 = arith.constant 0 : index
    %c0_0 = arith.constant 0 : index
    %0 = vector.load %arg1[%c0, %c0_0] : memref<16x32xf32, #tpu.memory_space<vmem>>, vector<16x32xf32>
    %c0_1 = arith.constant 0 : index
    %c0_2 = arith.constant 0 : index
    %1 = vector.load %arg2[%c0_1, %c0_2] : memref<32x32xf32, #tpu.memory_space<vmem>>, vector<32x32xf32>
    %cst = arith.constant dense<0.000000e+00> : vector<16x32xf32>
    %2 = tpu.matmul %0, %1, %cst {dimension_numbers = #tpu.dot_dimension_numbers<[1], [0], [0], [1], [0, 0, 1, 1], [], []>} : vector<16x32xf32>, vector<32x32xf32>, vector<16x32xf32> -> vector<16x32xf32>
    %c0_3 = arith.constant 0 : index
    %c0_4 = arith.constant 0 : index
    %3 = vector.load %arg3[%c0_3, %c0_4] : memref<1x32xf32, #tpu.memory_space<vmem>>, vector<1x32xf32>
    %4 = vector.broadcast %3 : vector<1x32xf32> to vector<16x32xf32>
    %5 = arith.addf %2, %4 : vector<16x32xf32>
    %c0_5 = arith.constant 0 : index
    %6 = memref.load %arg6[%c0_5] : memref<1xf32, #tpu.memory_space<smem>>
    %7 = vector.broadcast %6 : f32 to vector<16x32xf32>
    %8 = arith.mulf %5, %7 : vector<16x32xf32>
    %9 = arith.negf %8 : vector<16x32xf32>
    %10 = math.exp %9 : vector<16x32xf32>
    %cst_6 = arith.constant 1.000000e+00 : f32
    %11 = vector.broadcast %cst_6 : f32 to vector<16x32xf32>
    %12 = arith.addf %11, %10 : vector<16x32xf32>
    %13 = arith.divf %11, %12 : vector<16x32xf32>
    %14 = arith.mulf %0, %13 : vector<16x32xf32>
    %15 = arith.subf %0, %14 : vector<16x32xf32>
    %16 = arith.mulf %5, %13 : vector<16x32xf32>
    %c0_7 = arith.constant 0 : index
    %c0_8 = arith.constant 0 : index
    %17 = vector.load %arg4[%c0_7, %c0_8] : memref<32x32xf32, #tpu.memory_space<vmem>>, vector<32x32xf32>
    %cst_9 = arith.constant dense<0.000000e+00> : vector<16x32xf32>
    %18 = tpu.matmul %15, %17, %cst_9 {dimension_numbers = #tpu.dot_dimension_numbers<[1], [0], [0], [1], [0, 0, 1, 1], [], []>} : vector<16x32xf32>, vector<32x32xf32>, vector<16x32xf32> -> vector<16x32xf32>
    %c0_10 = arith.constant 0 : index
    %c0_11 = arith.constant 0 : index
    %19 = vector.load %arg5[%c0_10, %c0_11] : memref<32x32xf32, #tpu.memory_space<vmem>>, vector<32x32xf32>
    %cst_12 = arith.constant dense<0.000000e+00> : vector<16x32xf32>
    %20 = tpu.matmul %16, %19, %cst_12 {dimension_numbers = #tpu.dot_dimension_numbers<[1], [0], [0], [1], [0, 0, 1, 1], [], []>} : vector<16x32xf32>, vector<32x32xf32>, vector<16x32xf32> -> vector<16x32xf32>
    %21 = arith.addf %18, %20 : vector<16x32xf32>
    %c0_13 = arith.constant 0 : index
    %c0_14 = arith.constant 0 : index
    %22 = vector.load %arg7[%c0_13, %c0_14] : memref<16x32xf32, #tpu.memory_space<vmem>>, vector<16x32xf32>
    tpu.vector_store %arg7[%c0_13, %c0_14], %21 {strides = array<i32>} : memref<16x32xf32, #tpu.memory_space<vmem>>, vector<16x32xf32>,
    return
  }
  func.func @transform_0(%arg0: i32) -> (i32, i32) {
    %c0_i32 = arith.constant 0 : i32
    %c0_i32_0 = arith.constant 0 : i32
    return %arg0, %c0_i32 : i32, i32
  }
  func.func @transform_1(%arg0: i32) -> (i32, i32) {
    %c0_i32 = arith.constant 0 : i32
    %c0_i32_0 = arith.constant 0 : i32
    %c0_i32_1 = arith.constant 0 : i32
    return %c0_i32, %c0_i32_0 : i32, i32
  }
  func.func @transform_2(%arg0: i32) -> (i32, i32) {
    %c0_i32 = arith.constant 0 : i32
    %c0_i32_0 = arith.constant 0 : i32
    %c0_i32_1 = arith.constant 0 : i32
    return %c0_i32, %c0_i32_0 : i32, i32
  }
  func.func @transform_3(%arg0: i32) -> (i32, i32) {
    %c0_i32 = arith.constant 0 : i32
    %c0_i32_0 = arith.constant 0 : i32
    %c0_i32_1 = arith.constant 0 : i32
    return %c0_i32, %c0_i32_0 : i32, i32
  }
  func.func @transform_4(%arg0: i32) -> (i32, i32) {
    %c0_i32 = arith.constant 0 : i32
    %c0_i32_0 = arith.constant 0 : i32
    %c0_i32_1 = arith.constant 0 : i32
    return %c0_i32, %c0_i32_0 : i32, i32
  }
  func.func @transform_5(%arg0: i32) -> i32 {
    %c0_i32 = arith.constant 0 : i32
    %c0_i32_0 = arith.constant 0 : i32
    return %c0_i32 : i32
  }
  func.func @transform_6(%arg0: i32) -> (i32, i32) {
    %c0_i32 = arith.constant 0 : i32
    %c0_i32_0 = arith.constant 0 : i32
    return %arg0, %c0_i32 : i32, i32
  }
}

</mosaic_0001>

<bundles_post_ra>
// kernel: tpu_custom_call.1
= control target key start
LH: loop header
LB: loop body
LE: loop exit
PB: predicated region body
PF: predicated region fallthrough
CT: control target
= control target key end

     0   :  { %12 = vsyncpa [#allocation4], 0  ;;  %s517_s0 = inlined_call_operand.hbm [shape: f32[16,32], index: 0, kind: input, shape index: {}]   ;;  %s518_s1 = inlined_call_operand.hbm [shape: f32[32,32], index: 1, kind: input, shape index: {}]   ;;  %s519_s2 = inlined_call_operand.vmem [shape: f32[1,32], index: 2, kind: input, shape index: {}]   ;;  %s520_s3 = inlined_call_operand.hbm [shape: f32[32,32], index: 3, kind: input, shape index: {}]   ;;  %s521_s4 = inlined_call_operand.hbm [shape: f32[32,32], index: 4, kind: input, shape index: {}]   ;;  %s522_s5 = inlined_call_operand.<no memory space> [shape: f32[1], index: 5, kind: input, shape index: {}]   ;;  %s523_s6 = inlined_call_operand.hbm [shape: f32[16,32], index: 6, kind: output, shape index: {}]  }
   0x1   :  { %13 = vsyncpa [#allocation7], 0 }
   0x2   :  { %14 = vsyncpa [#allocation10], 0 }
   0x3   :  { %15 = vsyncpa [#allocation5], 0  ;;  %s33_s23 = sshll.u32 %s518_s1, 4  ;;  %s421_s24 = smov [#allocation6]   ;;  %s34_s23 = int_to_ptr.hbm [resolvable:$true] %s33_s23 }
   0x4   :  { %s35_s25 = sshll.u32 %s421_s24, 4  ;;  %s20_s28 = sshll.u32 %s517_s0, 4  ;;  %s36_s25 = int_to_ptr.vmem [resolvable:$true] %s35_s25  ;;  %s21_s28 = int_to_ptr.hbm [resolvable:$true] %s20_s28 }
   0x5   :  { %s422_s29 = smov 128   ;;  %s423_s30 = smov 8  }
   0x6   :  { %41 = dma.hbm_to_vmem [thread:$0]  %s34_s23, 512, %s36_s25, [#allocation7], %s422_s29, %s422_s29, %s423_s30  }
   0x7   :  { %s424_s7 = smov [#allocation3]   ;;  %s48_s1 = sshll.u32 %s520_s3, 4  ;;  %s49_s1 = int_to_ptr.hbm [resolvable:$true] %s48_s1 }
   0x8   :  { %s22_s8 = sshll.u32 %s424_s7, 4  ;;  %s61_s12 = sshll.u32 %s521_s4, 4  ;;  %s23_s8 = int_to_ptr.vmem [resolvable:$true] %s22_s8  ;;  %s62_s12 = int_to_ptr.hbm [resolvable:$true] %s61_s12 }
   0x9   :  { %28 = dma.hbm_to_vmem [thread:$0]  %s21_s28, 256, %s23_s8, [#allocation4], %s422_s29, %s422_s29, %s423_s30  }
   0xa   :  { %s425_s13 = smov [#allocation8]   ;;  %s426_s15 = smov [#allocation9]  }
   0xb   :  { %s50_s14 = sshll.u32 %s425_s13, 4  ;;  %s63_s3 = sshll.u32 %s426_s15, 4  ;;  %s51_s14 = int_to_ptr.vmem [resolvable:$true] %s50_s14  ;;  %s64_s3 = int_to_ptr.vmem [resolvable:$true] %s63_s3 }
   0xc   :  { %56 = dma.hbm_to_vmem [thread:$0]  %s49_s1, 512, %s51_s14, [#allocation7], %s422_s29, %s422_s29, %s423_s30  }
   0xd   :  { %69 = dma.hbm_to_vmem [thread:$0]  %s62_s12, 512, %s64_s3, [#allocation10], %s422_s29, %s422_s29, %s423_s30  }
   0xe   :  { %413 = dma.done.wait [#allocation4], 256  }
   0xf   :  { %414 = vsyncadd [#allocation4], 4294967040 }
  0x10   :  { %415 = dma.done.wait [#allocation7], 1024  }
  0x11   :  { %416 = vsyncadd [#allocation7], 4294966272 }
  0x12   :  { %417 = dma.done.wait [#allocation10], 512  }
  0x13   :  { %418 = vsyncadd [#allocation10], 4294966784  ;;  %v93_v0 = vld [vmem:[#allocation6 + $0x18] sm:$0xff]  ;;  %v92_v1 = vld [vmem:[#allocation6 + $0x10] sm:$0xff]  ;;  %vm98_vm0 = vcmask 261120   ;;  %v129_v13 = vstv %s522_s5  ;;  %s250_s21 = sshll.u32 %s523_s6, 4  ;;  %s251_s21 = int_to_ptr.hbm [resolvable:$true] %s250_s21 }
  0x14   :  { %117 = vmatpush.msra.mxu0 %v93_v0  ;;  %273 = vmatpush.msra.mxu3 %v93_v0  ;;  %v91_v2 = vld [vmem:[#allocation6 + $0x8] sm:$0xff]  ;;  %v90_v3 = vld [vmem:[#allocation6] sm:$0xff]  ;;  %v487_v4 = vld [vmem:[#allocation3] sm:$0xff] }
  0x15   :  { %v489_v5 = vld [vmem:[#allocation3 + $0x8] sm:$0xff]  ;;  %v284_v7 = vld [vmem:[%s519_s2] ss:$0 sm:$0xff]  ;;  %v181_v10 = vld [vmem:[#allocation9 + $0x8] sm:$0xff]  ;;  %s427_s2 = smov [#allocation11]  }
  0x16   :  { %118 = vmatpush.msra.mxu0 %v92_v1  ;;  %274 = vmatpush.msra.mxu3 %v92_v1  ;;  %v183_v6 = vld [vmem:[#allocation9 + $0x18] sm:$0xff]  ;;  %v182_v8 = vld [vmem:[#allocation9 + $0x10] sm:$0xff]  ;;  %v180_v15 = vld [vmem:[#allocation9] sm:$0xff]  ;;  %s248_s5 = sshll.u32 %s427_s2, 4  ;;  %s249_s5 = int_to_ptr.vmem [resolvable:$true] %s248_s5 }
  0x17   :  { %202 = vmatpush.msra.mxu1 %v183_v6  ;;  %v179_v9 = vld [vmem:[#allocation8 + $0x18] sm:$0xff]  ;;  %v178_v11 = vld [vmem:[#allocation8 + $0x10] sm:$0xff]  ;;  %v177_v16 = vld [vmem:[#allocation8 + $0x8] sm:$0xff] }
  0x18   :  { %119 = vmatpush.msra.mxu0 %v91_v2  ;;  %275 = vmatpush.msra.mxu3 %v91_v2  ;;  %v176_v18 = vld [vmem:[#allocation8] sm:$0xff] }
  0x19   :  { %203 = vmatpush.msra.mxu1 %v182_v8  ;;  %231 = vmatpush.msra.mxu2 %v179_v9 }
  0x1a   :  { %120 = vmatpush.msra.mxu0 %v90_v3  ;;  %276 = vmatpush.msra.mxu3 %v90_v3 }
  0x1b   :  { %265 = vmatmul.msk.f32.vlgmr.msra.gmra.mxu0 %vm98_vm0, %v487_v4  ;;  %266 = vmatmul.msk.f32.vlgmr.msra.gmra.mxu3 %vm98_vm0, %v489_v5 }
  0x1c   :  { %204 = vmatpush.msra.mxu1 %v181_v10  ;;  %232 = vmatpush.msra.mxu2 %v178_v11 }
  0x1e   :  { %205 = vmatpush.msra.mxu1 %v180_v15  ;;  %233 = vmatpush.msra.mxu2 %v177_v16 }
  0x20   :  { %234 = vmatpush.msra.mxu2 %v176_v18 }
  0x98   :  { %v122_v12 = vpop.f32.mrf.mxu0 }
  0x99   :  { %v123_v14 = vadd.f32 %v284_v7, %v122_v12 }
  0x9b   :  { %v130_v17 = vmul.f32 %v129_v13, %v123_v14 }
  0x9d   :  { %v267_v19 = vmul.f32 -1.442695, %v130_v17 }
  0x9e   :  { %v125_v20 = vpop.f32.mrf.mxu3 }
  0x9f   :  { %285 = vpow2.f32 %v267_v19  ;;  %v126_v21 = vadd.f32 %v284_v7, %v125_v20 }
  0xa1   :  { %v131_v22 = vmul.f32 %v129_v13, %v126_v21 }
  0xa3   :  { %v268_v23 = vmul.f32 -1.442695, %v131_v22 }
  0xa5   :  { %v286_v24 = vpop.eup %285  ;;  %287 = vpow2.f32 %v268_v23 }
  0xa6   :  { %v138_v25 = vadd.f32 1.0, %v286_v24 }
  0xa8   :  { %289 = vrcp.f32 %v138_v25  ;;  %v151_v31 = vand.u32 2147483648, %v138_v25  ;;  %v149_v33 = vand.u32 2147483647, %v138_v25  ;;  %vm145_vm2 = vweird.f32 %v138_v25 }
  0xaa   :  { %v152_v37 = vor.u32 1.1754944e-38, %v151_v31  ;;  %vm150_vm4 = vcmp.eq.f32.partialorder %v149_v33, 8.507059e+37 }
  0xab   :  { %v288_v26 = vpop.eup %287 }
  0xac   :  { %v139_v27 = vadd.f32 1.0, %v288_v26 }
  0xae   :  { %v290_v28 = vpop.eup %289  ;;  %291 = vrcp.f32 %v139_v27  ;;  %v164_v41 = vand.u32 2147483647, %v139_v27  ;;  %v166_v42 = vand.u32 2147483648, %v139_v27  ;;  %vm160_vm6 = vweird.f32 %v139_v27 }
  0xaf   :  { %v141_v29 = vmul.f32 %v290_v28, %v138_v25  ;;  %vm146_vm1 = vweird.f32 %v290_v28 }
  0xb0   :  { %vm147_vm3 = vmor %vm145_vm2, %vm146_vm1  ;;  %v167_v48 = vor.u32 1.1754944e-38, %v166_v42  ;;  %vm165_vm8 = vcmp.eq.f32.partialorder %v164_v41, 8.507059e+37 }
  0xb1   :  { %v142_v30 = vsub.f32 1.0, %v141_v29 }
  0xb3   :  { %v143_v32 = vmul.f32 %v290_v28, %v142_v30 }
  0xb4   :  { %v292_v34 = vpop.eup %291 }
  0xb5   :  { %v144_v35 = vadd.f32 %v290_v28, %v143_v32  ;;  %v156_v36 = vmul.f32 %v292_v34, %v139_v27  ;;  %vm161_vm5 = vweird.f32 %v292_v34 }
  0xb6   :  { %vm162_vm7 = vmor %vm160_vm6, %vm161_vm5 }
  0xb7   :  { %v148_v38 = vsel %vm147_vm3, %v290_v28, %v144_v35  ;;  %v157_v39 = vsub.f32 1.0, %v156_v36 }
  0xb8   :  { %v153_v40 = vsel %vm150_vm4, %v152_v37, %v148_v38 }
  0xb9   :  { %v170_v43 = vmul.f32 %v153_v40, %v487_v4  ;;  %v174_v44 = vmul.f32 %v153_v40, %v123_v14  ;;  %v158_v45 = vmul.f32 %v292_v34, %v157_v39 }
  0xbb   :  { %v159_v46 = vadd.f32 %v292_v34, %v158_v45  ;;  %269 = vmatmul.msk.f32.vlgmr.msra.gmra.mxu1 %vm98_vm0, %v174_v44  ;;  %v172_v47 = vsub.f32 %v487_v4, %v170_v43 }
  0xbd   :  { %v163_v49 = vsel %vm162_vm7, %v292_v34, %v159_v46  ;;  %271 = vmatmul.msk.f32.vlgmr.msra.gmra.mxu2 %vm98_vm0, %v172_v47 }
  0xbe   :  { %v168_v50 = vsel %vm165_vm8, %v167_v48, %v163_v49 }
  0xbf   :  { %v171_v51 = vmul.f32 %v168_v50, %v489_v5  ;;  %v175_v52 = vmul.f32 %v168_v50, %v126_v21 }
  0xc1   :  { %v173_v53 = vsub.f32 %v489_v5, %v171_v51 }
  0xc3   :  { %270 = vmatmul.msk.f32.gmra.mxu1 %vm98_vm0, %v175_v52 }
  0xc5   :  { %272 = vmatmul.msk.f32.gmra.mxu2 %vm98_vm0, %v173_v53 }
 0x138   :  { %v207_v54 = vpop.f32.mrf.mxu1 }
 0x140   :  { %v236_v55 = vpop.f32.mrf.mxu2  ;;  %v210_v57 = vpop.f32.mrf.mxu1 }
 0x141   :  { %v237_v56 = vadd.f32 %v236_v55, %v207_v54 }
 0x143   :  { %242 = vst.msk [vmem:[#allocation11] sm:$0xff] %vm98_vm0, %v237_v56 }
 0x148   :  { %v239_v58 = vpop.f32.mrf.mxu2 }
 0x149   :  { %v240_v59 = vadd.f32 %v239_v58, %v210_v57 }
 0x14b   :  { %243 = vst.msk [vmem:[#allocation11 + $0x8] sm:$0xff] %vm98_vm0, %v240_v59 }
 0x14c   :  { %256 = dma.vmem_to_hbm [thread:$0]  %s249_s5, 256, %s251_s21, [#allocation5], %s422_s29, %s422_s29, %s423_s30  }
 0x14d   :  { %419 = dma.done.wait [#allocation5], 256  }
 0x14e   :  { %420 = vsyncadd [#allocation5], 4294967040 }
 0x14f   :  { %261 = vsyncpa [#allocation4], 1 }
 0x150   :  { %262 = vsyncpa [#allocation7], 1 }
 0x151   :  { %263 = vsyncpa [#allocation10], 1 }
 0x152   :  { %264 = vsyncpa [#allocation5], 1 }

</bundles_post_ra>
